<compile_context>
chip_gen: v7x
topology: tpu7x:2x2x1
jax: 0.10.0
libtpu: 0.0.40
codegen_flags: <defaults>
</compile_context>

<pallas_src>
import jax
import jax.numpy as jnp
from jax.experimental import pallas as pl
from jax.experimental.pallas import tpu as pltpu

EPS = 1e-5


def _prenorm_kernel(x_ref, gamma_ref, beta_ref, w_ref, b_ref, o_ref, y_scr):
    # Grid: (row tiles, D_out tiles).  LayerNorm is computed once per row tile
    # (at j == 0) into a VMEM scratch and reused for every output-column tile.
    @pl.when(pl.program_id(1) == 0)
    def _():
        x = x_ref[...].astype(jnp.float32)
        # --- LayerNorm over last dim (biased variance, like torch.nn.LayerNorm)
        mean = jnp.mean(x, axis=-1, keepdims=True)
        centered = x - mean
        var = jnp.mean(centered * centered, axis=-1, keepdims=True)
        inv = jax.lax.rsqrt(var + EPS)
        y = centered * inv * gamma_ref[...] + beta_ref[...]     # (TM, D) f32
        y_scr[...] = y.astype(y_scr.dtype)                      # bf16 for MXU

    # --- fn = Linear: y @ W^T[:, j-tile] + b[j-tile], bf16 MXU, f32 accumulate
    out = jnp.dot(y_scr[...], w_ref[...], preferred_element_type=jnp.float32)
    out = out + b_ref[...].astype(jnp.float32)
    o_ref[...] = out.astype(o_ref.dtype)


def prenorm_linear(x, gamma, beta, w, b, *,
                   row_tile=512, col_tile=512,
                   matmul_dtype=jnp.bfloat16):
    """x: (B, N, D). gamma/beta: (D,). w: (D_out, D_in) torch-style. b: (D_out,)."""
    B, N, D = x.shape
    D_out = w.shape[0]
    M = B * N
    x2 = x.reshape(M, D)

    # Row tile: big for DMA/MXU efficiency, clamped when M is small.  Keep a
    # multiple of 8 (sublanes); 512 default is 256-aligned for v7x's MXU.
    tm = min(row_tile, pl.cdiv(M, 8) * 8)
    # Column tile over D_out: full width if it fits, else a 128-multiple tile
    # (keeps the output store lane-dense on real configs with D_out >= 128).
    tn = D_out if D_out <= col_tile else col_tile

    gamma2 = gamma.reshape(1, D).astype(jnp.float32)
    beta2 = beta.reshape(1, D).astype(jnp.float32)
    wt = jnp.transpose(w).astype(matmul_dtype)     # (D_in, D_out), bf16 operand
    b2 = b.reshape(1, D_out).astype(jnp.float32)

    grid = (pl.cdiv(M, tm), pl.cdiv(D_out, tn))

    out = pl.pallas_call(
        _prenorm_kernel,
        out_shape=jax.ShapeDtypeStruct((M, D_out), x.dtype),
        grid_spec=pltpu.PrefetchScalarGridSpec(
            num_scalar_prefetch=0,
            grid=grid,
            in_specs=[
                pl.BlockSpec((tm, D), lambda i, j: (i, 0)),    # x rows
                pl.BlockSpec((1, D), lambda i, j: (0, 0)),     # gamma
                pl.BlockSpec((1, D), lambda i, j: (0, 0)),     # beta
                pl.BlockSpec((D, tn), lambda i, j: (0, j)),    # W^T column tile
                pl.BlockSpec((1, tn), lambda i, j: (0, j)),    # bias tile
            ],
            out_specs=pl.BlockSpec((tm, tn), lambda i, j: (i, j)),
            scratch_shapes=[pltpu.VMEM((tm, D), matmul_dtype)],  # LN result cache
        ),
        compiler_params=pltpu.CompilerParams(
            dimension_semantics=("parallel", "arbitrary"),
            vmem_limit_bytes=64 * 1024 * 1024,
        ),
    )(x2, gamma2, beta2, wt, b2)

    return out.reshape(B, N, D_out)


def prenorm_linear_ref(x, gamma, beta, w, b):
    xf = x.astype(jnp.float32)
    mean = jnp.mean(xf, axis=-1, keepdims=True)
    var = jnp.mean((xf - mean) ** 2, axis=-1, keepdims=True)
    xn = (xf - mean) * jax.lax.rsqrt(var + EPS)
    y = xn * gamma + beta
    return (y @ w.T + b).astype(x.dtype)


if __name__ == "__main__":
    B, N, D = 2, 8, 32
    D_out = D   # square Linear for the test

    key = jax.random.PRNGKey(0)
    kx, kg, kb, kw, kbias = jax.random.split(key, 5)

    x = jax.random.normal(kx, (B, N, D), dtype=jnp.float32)
    # nn.LayerNorm(dim) params (default init is ones/zeros; perturb so the
    # test is non-trivial).
    gamma = 1.0 + 0.1 * jax.random.normal(kg, (D,), dtype=jnp.float32)
    beta = 0.1 * jax.random.normal(kb, (D,), dtype=jnp.float32)
    # fn = Linear(D, D_out), torch-style weight (out, in).
    w = 0.1 * jax.random.normal(kw, (D_out, D), dtype=jnp.float32)
    b = 0.1 * jax.random.normal(kbias, (D_out,), dtype=jnp.float32)

    out = prenorm_linear(x, gamma, beta, w, b)
    out = jax.block_until_ready(out)

    ref = prenorm_linear_ref(x, gamma, beta, w, b)
    assert out.shape == (B, N, D_out)
    # bf16 MXU operands (f32 accumulation) vs. pure-f32 reference: allow ~1e-2.
    assert jnp.allclose(out, ref, atol=2e-2, rtol=2e-2), "mismatch vs reference"

    print("KERNEL_OK")
</pallas_src>

<mosaic_0001>
module attributes {stable_mosaic.version = 11 : i64} {
  func.func @_prenorm_kernel(%arg0: i32, %arg1: i32, %arg2: memref<16x32xf32, #tpu.memory_space<vmem>>, %arg3: memref<1x32xf32, #tpu.memory_space<vmem>>, %arg4: memref<1x32xf32, #tpu.memory_space<vmem>>, %arg5: memref<32x32xbf16, #tpu.memory_space<vmem>>, %arg6: memref<1x32xf32, #tpu.memory_space<vmem>>, %arg7: memref<16x32xf32, #tpu.memory_space<vmem>>, %arg8: memref<16x32xbf16, #tpu.memory_space<vmem>>) attributes {dimension_semantics = [#tpu.dimension_semantics<parallel>, #tpu.dimension_semantics<arbitrary>], iteration_bounds = array<i64: 1, 1>, scalar_prefetch = 0 : i64, scratch_operands = 1 : i64, tpu.core_type = #tpu.core_type<tc>, window_params = [{transform_indices = @transform_0, window_bounds = array<i64: 16, 32>}, {pipeline_mode = #tpu.pipeline_mode<synchronous>, transform_indices = @transform_1, window_bounds = array<i64: 1, 32>}, {pipeline_mode = #tpu.pipeline_mode<synchronous>, transform_indices = @transform_2, window_bounds = array<i64: 1, 32>}, {transform_indices = @transform_3, window_bounds = array<i64: 32, 32>}, {transform_indices = @transform_4, window_bounds = array<i64: 1, 32>}, {transform_indices = @transform_5, window_bounds = array<i64: 16, 32>}]} {
    %c0_i32 = arith.constant 0 : i32
    %0 = arith.cmpi eq, %arg1, %c0_i32 : i32
    %1 = arith.extui %0 : i1 to i32
    %c0_i32_0 = arith.constant 0 : i32
    %2 = arith.cmpi ne, %1, %c0_i32_0 : i32
    scf.if %2 {
      %c0_8 = arith.constant 0 : index
      %c0_9 = arith.constant 0 : index
      %10 = vector.load %arg2[%c0_8, %c0_9] : memref<16x32xf32, #tpu.memory_space<vmem>>, vector<16x32xf32>
      %cst_10 = arith.constant dense<0.000000e+00> : vector<16xf32>
      %11 = vector.multi_reduction <add>, %10, %cst_10 [1] : vector<16x32xf32> to vector<16xf32>
      %12 = vector.shape_cast %11 : vector<16xf32> to vector<16x1xf32>
      %cst_11 = arith.constant 3.200000e+01 : f32
      %13 = vector.broadcast %cst_11 : f32 to vector<16x1xf32>
      %14 = arith.divf %12, %13 : vector<16x1xf32>
      %15 = vector.broadcast %14 : vector<16x1xf32> to vector<16x32xf32>
      %16 = arith.subf %10, %15 : vector<16x32xf32>
      %17 = arith.mulf %16, %16 : vector<16x32xf32>
      %cst_12 = arith.constant dense<0.000000e+00> : vector<16xf32>
      %18 = vector.multi_reduction <add>, %17, %cst_12 [1] : vector<16x32xf32> to vector<16xf32>
      %19 = vector.shape_cast %18 : vector<16xf32> to vector<16x1xf32>
      %cst_13 = arith.constant 3.200000e+01 : f32
      %20 = vector.broadcast %cst_13 : f32 to vector<16x1xf32>
      %21 = arith.divf %19, %20 : vector<16x1xf32>
      %cst_14 = arith.constant 9.99999974E-6 : f32
      %22 = vector.broadcast %cst_14 : f32 to vector<16x1xf32>
      %23 = arith.addf %21, %22 : vector<16x1xf32>
      %24 = math.rsqrt %23 : vector<16x1xf32>
      %25 = vector.broadcast %24 : vector<16x1xf32> to vector<16x32xf32>
      %26 = arith.mulf %16, %25 : vector<16x32xf32>
      %c0_15 = arith.constant 0 : index
      %c0_16 = arith.constant 0 : index
      %27 = vector.load %arg3[%c0_15, %c0_16] : memref<1x32xf32, #tpu.memory_space<vmem>>, vector<1x32xf32>
      %28 = vector.broadcast %27 : vector<1x32xf32> to vector<16x32xf32>
      %29 = arith.mulf %26, %28 : vector<16x32xf32>
      %c0_17 = arith.constant 0 : index
      %c0_18 = arith.constant 0 : index
      %30 = vector.load %arg4[%c0_17, %c0_18] : memref<1x32xf32, #tpu.memory_space<vmem>>, vector<1x32xf32>
      %31 = vector.broadcast %30 : vector<1x32xf32> to vector<16x32xf32>
      %32 = arith.addf %29, %31 : vector<16x32xf32>
      %33 = arith.truncf %32 : vector<16x32xf32> to vector<16x32xbf16>
      %c0_19 = arith.constant 0 : index
      %c0_20 = arith.constant 0 : index
      %34 = vector.load %arg8[%c0_19, %c0_20] : memref<16x32xbf16, #tpu.memory_space<vmem>>, vector<16x32xbf16>
      tpu.vector_store %arg8[%c0_19, %c0_20], %33 {strides = array<i32>} : memref<16x32xbf16, #tpu.memory_space<vmem>>, vector<16x32xbf16>,
    } else {
    }
    %c0 = arith.constant 0 : index
    %c0_1 = arith.constant 0 : index
    %3 = vector.load %arg8[%c0, %c0_1] : memref<16x32xbf16, #tpu.memory_space<vmem>>, vector<16x32xbf16>
    %c0_2 = arith.constant 0 : index
    %c0_3 = arith.constant 0 : index
    %4 = vector.load %arg5[%c0_2, %c0_3] : memref<32x32xbf16, #tpu.memory_space<vmem>>, vector<32x32xbf16>
    %cst = arith.constant dense<0.000000e+00> : vector<16x32xf32>
    %5 = tpu.matmul %3, %4, %cst {dimension_numbers = #tpu.dot_dimension_numbers<[1], [0], [0], [1], [0, 0, 1, 1], [], []>} : vector<16x32xbf16>, vector<32x32xbf16>, vector<16x32xf32> -> vector<16x32xf32>
    %c0_4 = arith.constant 0 : index
    %c0_5 = arith.constant 0 : index
    %6 = vector.load %arg6[%c0_4, %c0_5] : memref<1x32xf32, #tpu.memory_space<vmem>>, vector<1x32xf32>
    %7 = vector.broadcast %6 : vector<1x32xf32> to vector<16x32xf32>
    %8 = arith.addf %5, %7 : vector<16x32xf32>
    %c0_6 = arith.constant 0 : index
    %c0_7 = arith.constant 0 : index
    %9 = vector.load %arg7[%c0_6, %c0_7] : memref<16x32xf32, #tpu.memory_space<vmem>>, vector<16x32xf32>
    tpu.vector_store %arg7[%c0_6, %c0_7], %8 {strides = array<i32>} : memref<16x32xf32, #tpu.memory_space<vmem>>, vector<16x32xf32>,
    return
  }
  func.func @transform_0(%arg0: i32, %arg1: i32) -> (i32, i32) {
    %c0_i32 = arith.constant 0 : i32
    %c0_i32_0 = arith.constant 0 : i32
    return %arg0, %c0_i32 : i32, i32
  }
  func.func @transform_1(%arg0: i32, %arg1: i32) -> (i32, i32) {
    %c0_i32 = arith.constant 0 : i32
    %c0_i32_0 = arith.constant 0 : i32
    %c0_i32_1 = arith.constant 0 : i32
    return %c0_i32, %c0_i32_0 : i32, i32
  }
  func.func @transform_2(%arg0: i32, %arg1: i32) -> (i32, i32) {
    %c0_i32 = arith.constant 0 : i32
    %c0_i32_0 = arith.constant 0 : i32
    %c0_i32_1 = arith.constant 0 : i32
    return %c0_i32, %c0_i32_0 : i32, i32
  }
  func.func @transform_3(%arg0: i32, %arg1: i32) -> (i32, i32) {
    %c0_i32 = arith.constant 0 : i32
    %c0_i32_0 = arith.constant 0 : i32
    return %c0_i32, %arg1 : i32, i32
  }
  func.func @transform_4(%arg0: i32, %arg1: i32) -> (i32, i32) {
    %c0_i32 = arith.constant 0 : i32
    %c0_i32_0 = arith.constant 0 : i32
    return %c0_i32, %arg1 : i32, i32
  }
  func.func @transform_5(%arg0: i32, %arg1: i32) -> (i32, i32) {
    %c0_i32 = arith.constant 0 : i32
    return %arg0, %arg1 : i32, i32
  }
}

</mosaic_0001>

<bundles_post_ra>
// kernel: tpu_custom_call.1
= control target key start
LH: loop header
LB: loop body
LE: loop exit
PB: predicated region body
PF: predicated region fallthrough
CT: control target
= control target key end

     0   :  { %10 = vsyncpa [#allocation4], 0  ;;  %s538_s0 = inlined_call_operand.hbm [shape: f32[16,32], index: 0, kind: input, shape index: {}]   ;;  %s539_s1 = inlined_call_operand.hbm [shape: f32[1,32], index: 1, kind: input, shape index: {}]   ;;  %s540_s2 = inlined_call_operand.hbm [shape: f32[1,32], index: 2, kind: input, shape index: {}]   ;;  %s541_s3 = inlined_call_operand.hbm [shape: bf16[32,32], index: 3, kind: input, shape index: {}]   ;;  %s542_s4 = inlined_call_operand.hbm [shape: f32[1,32], index: 4, kind: input, shape index: {}]   ;;  %s543_s5 = inlined_call_operand.hbm [shape: f32[16,32], index: 5, kind: output, shape index: {}]  }
   0x1   :  { %11 = vsyncpa [#allocation7], 0 }
   0x2   :  { %12 = vsyncpa [#allocation10], 0 }
   0x3   :  { %13 = vsyncpa [#allocation5], 0  ;;  %s403_s18 = smov [#allocation6]   ;;  %s404_s20 = smov [#allocation9]  }
   0x4   :  { %s32_s19 = sshll.u32 %s403_s18, 4  ;;  %s51_s21 = sshll.u32 %s404_s20, 4  ;;  %s33_s19 = int_to_ptr.vmem [resolvable:$true] %s32_s19  ;;  %s445_s21 = int_to_ptr.vmem [resolvable:$true] %s51_s21 }
   0x5   :  { %s263_s24 = scalar_lea.hbm %s539_s1, 16 }
   0x6   :  { %p264_p0 = scmp.ne.s32.totalorder %s539_s1, %s263_s24  ;;  %p267_p1 = scmp.lt.u32.totalorder %s263_s24, %s539_s1 }
   0x8   :  { %p269_p2 = pnand %p267_p1, %p264_p0 }
   0xa   :  { %272 = shalt.err (!%p269_p2)
}
   0xb   :  { %s273_s29 = scalar_lea.vmem %s33_s19, 16  ;;  %s277_s30 = scalar_lea.vmem %s33_s19, 32 }
   0xc   :  { %p274_p3 = scmp.ne.s32.totalorder %s33_s19, %s273_s29  ;;  %p278_p4 = scmp.lt.s32.totalorder %s33_s19, %s33_s19 }
   0xd   :  { %p279_p5 = scmp.lt.s32.totalorder %s277_s30, %s273_s29 }
   0xf   :  { %p280_p6 = por %p279_p5, %p278_p4 }
  0x11   :  { %p281_p7 = pnand %p280_p6, %p274_p3 }
  0x13   :  { %284 = shalt.err (!%p281_p7)
}
  0x14   :  { %35 = dma.hbm_to_vmem [thread:$0]  %s539_s1, 16, %s33_s19, [#allocation7]  }
  0x15   :  { %s285_s10 = scalar_lea.hbm %s541_s3, 256 }
  0x16   :  { %p286_p8 = scmp.ne.s32.totalorder %s541_s3, %s285_s10  ;;  %p289_p9 = scmp.lt.u32.totalorder %s285_s10, %s541_s3 }
  0x18   :  { %p291_p10 = pnand %p289_p9, %p286_p8 }
  0x1a   :  { %294 = shalt.err (!%p291_p10)
}
  0x1b   :  { %s295_s15 = scalar_lea.vmem %s445_s21, 256  ;;  %p300_p12 = scmp.lt.s32.totalorder %s445_s21, %s445_s21 }
  0x1c   :  { %p296_p11 = scmp.ne.s32.totalorder %s445_s21, %s295_s15  ;;  %p301_p13 = scmp.lt.s32.totalorder %s295_s15, %s295_s15 }
  0x1e   :  { %p302_p0 = por %p301_p13, %p300_p12 }
  0x20   :  { %p303_p1 = pnand %p302_p0, %p296_p11 }
  0x22   :  { %306 = shalt.err (!%p303_p1)
}
  0x23   :  { %s405_s1 = smov 64   ;;  %s406_s16 = smov 4  }
  0x24   :  { %57 = dma.hbm_to_vmem [thread:$0]  %s541_s3, 256, %s445_s21, [#allocation10], %s405_s1, %s405_s1, %s406_s16  }
  0x25   :  { %s407_s19 = smov [#allocation3]   ;;  %s307_s24 = scalar_lea.hbm %s538_s0, 256 }
  0x26   :  { %s19_s20 = sshll.u32 %s407_s19, 4  ;;  %p308_p2 = scmp.ne.s32.totalorder %s538_s0, %s307_s24  ;;  %s20_s20 = int_to_ptr.vmem [resolvable:$true] %s19_s20 }
  0x27   :  { %p311_p3 = scmp.lt.u32.totalorder %s307_s24, %s538_s0 }
  0x29   :  { %p313_p4 = pnand %p311_p3, %p308_p2 }
  0x2b   :  { %316 = shalt.err (!%p313_p4)
}
  0x2c   :  { %s317_s29 = scalar_lea.vmem %s20_s20, 256  ;;  %p322_p6 = scmp.lt.s32.totalorder %s20_s20, %s20_s20 }
  0x2d   :  { %p318_p5 = scmp.ne.s32.totalorder %s20_s20, %s317_s29  ;;  %p323_p7 = scmp.lt.s32.totalorder %s317_s29, %s317_s29 }
  0x2f   :  { %p324_p8 = por %p323_p7, %p322_p6 }
  0x31   :  { %p325_p9 = pnand %p324_p8, %p318_p5 }
  0x33   :  { %328 = shalt.err (!%p325_p9)
}
  0x34   :  { %s408_s3 = smov 128   ;;  %s409_s21 = smov 8  }
  0x35   :  { %25 = dma.hbm_to_vmem [thread:$0]  %s538_s0, 256, %s20_s20, [#allocation4], %s408_s3, %s408_s3, %s409_s21  }
  0x36   :  { %s410_s7 = smov [#allocation8]   ;;  %s411_s9 = smov [#allocation11]  }
  0x37   :  { %s42_s8 = sshll.u32 %s410_s7, 4  ;;  %s64_s10 = sshll.u32 %s411_s9, 4  ;;  %s43_s8 = int_to_ptr.vmem [resolvable:$true] %s42_s8  ;;  %s65_s10 = int_to_ptr.vmem [resolvable:$true] %s64_s10 }
  0x38   :  { %s329_s13 = scalar_lea.hbm %s540_s2, 16 }
  0x39   :  { %p330_p10 = scmp.ne.s32.totalorder %s540_s2, %s329_s13  ;;  %p333_p11 = scmp.lt.u32.totalorder %s329_s13, %s540_s2 }
  0x3b   :  { %p335_p12 = pnand %p333_p11, %p330_p10 }
  0x3d   :  { %338 = shalt.err (!%p335_p12)
}
  0x3e   :  { %s339_s0 = scalar_lea.vmem %s43_s8, 16  ;;  %s343_s17 = scalar_lea.vmem %s43_s8, 32 }
  0x3f   :  { %p340_p13 = scmp.ne.s32.totalorder %s43_s8, %s339_s0  ;;  %p344_p0 = scmp.lt.s32.totalorder %s43_s8, %s43_s8 }
  0x40   :  { %p345_p1 = scmp.lt.s32.totalorder %s343_s17, %s339_s0 }
  0x42   :  { %p346_p2 = por %p345_p1, %p344_p0 }
  0x44   :  { %p347_p3 = pnand %p346_p2, %p340_p13 }
  0x46   :  { %350 = shalt.err (!%p347_p3)
}
  0x47   :  { %45 = dma.hbm_to_vmem [thread:$0]  %s540_s2, 16, %s43_s8, [#allocation7]  }
  0x48   :  { %s351_s23 = scalar_lea.hbm %s542_s4, 16 }
  0x49   :  { %p352_p4 = scmp.ne.s32.totalorder %s542_s4, %s351_s23  ;;  %p355_p5 = scmp.lt.u32.totalorder %s351_s23, %s542_s4 }
  0x4b   :  { %p357_p6 = pnand %p355_p5, %p352_p4 }
  0x4d   :  { %360 = shalt.err (!%p357_p6)
}
  0x4e   :  { %s361_s28 = scalar_lea.vmem %s65_s10, 16  ;;  %s365_s29 = scalar_lea.vmem %s65_s10, 32 }
  0x4f   :  { %p362_p7 = scmp.ne.s32.totalorder %s65_s10, %s361_s28  ;;  %p366_p8 = scmp.lt.s32.totalorder %s65_s10, %s65_s10 }
  0x50   :  { %p367_p9 = scmp.lt.s32.totalorder %s365_s29, %s361_s28 }
  0x52   :  { %p368_p10 = por %p367_p9, %p366_p8 }
  0x54   :  { %p369_p11 = pnand %p368_p10, %p362_p7 }
  0x56   :  { %372 = shalt.err (!%p369_p11)
}
  0x57   :  { %67 = dma.hbm_to_vmem [thread:$0]  %s542_s4, 16, %s65_s10, [#allocation10]  }
  0x58   :  { %395 = dma.done.wait [#allocation4], 256  }
  0x59   :  { %396 = vsyncadd [#allocation4], 4294967040 }
  0x5a   :  { %397 = dma.done.wait [#allocation7], 32  }
  0x5b   :  { %398 = vsyncadd [#allocation7], 4294967264 }
  0x5c   :  { %399 = dma.done.wait [#allocation10], 272  }
  0x5d   :  { %400 = vsyncadd [#allocation10], 4294967024  ;;  %vm90_vm0 = vcmask 261120   ;;  %v88_v0 = vld [vmem:[#allocation3] sm:$0xff]  ;;  %v89_v1 = vld [vmem:[#allocation3 + $0x8] sm:$0xff]  ;;  %v412_v15 = vmov 0.0  }
  0x5e   :  { %v91_v2 = vsel %vm90_vm0, %v88_v0, 0.0  ;;  %v94_v3 = vsel %vm90_vm0, %v89_v1, 0.0  ;;  %v257_v14 = vld [vmem:[#allocation9] sm:$0xff]   ;;  %237 = vmatprep.subr.bf16.mxu0 %v412_v15  ;;  %v258_v16 = vld [vmem:[#allocation9 + $0x8] sm:$0xff]   ;;  %vm413_vm1 = vmmov 0   ;;  %s414_s4 = smov [#allocation12]  }
  0x5f   :  { %92 = vadd.xlane.f32.xlu0 %v91_v2  ;;  %238 = vmatpush3.bf16.msra.mxu0 %v257_v14  ;;  %v228_v25 = vld [vmem:[#allocation6] ss:$0 sm:$0xff]  ;;  %v229_v29 = vld [vmem:[#allocation8] ss:$0 sm:$0xff]  ;;  %v230_v35 = vld [vmem:[#allocation11] ss:$0 sm:$0xff] }
  0x60   :  { %241 = vmatprep.mubr.msk.bf16.mxu0 %vm413_vm1, %v412_v15  ;;  %239 = vmatprep.subr.bf16.mxu0 %v412_v15  ;;  %s214_s6 = sshll.u32 %s414_s4, 4  ;;  %s215_s6 = int_to_ptr.vmem [resolvable:$true] %s214_s6 }
  0x61   :  { %s373_s7 = scalar_lea.vmem %s215_s6, 256  ;;  %p378_p13 = scmp.lt.s32.totalorder %s215_s6, %s215_s6 }
  0x62   :  { %p374_p12 = scmp.ne.s32.totalorder %s215_s6, %s373_s7  ;;  %p379_p0 = scmp.lt.s32.totalorder %s373_s7, %s373_s7 }
  0x63   :  { %95 = vadd.xlane.f32.xlu0 %v94_v3  ;;  %240 = vmatpush3.bf16.msra.mxu0 %v258_v16 }
  0x64   :  { %p380_p1 = por %p379_p0, %p378_p13 }
  0x66   :  { %p381_p2 = pnand %p380_p1, %p374_p12 }
  0xec   :  { %v93_v4 = vpop.xlane.xlu0 %92 }
  0xed   :  { %v98_v5 = vmul.f32 0.03125, %v93_v4 }
  0xef   :  { %v100_v6 = vsub.f32 %v88_v0, %v98_v5 }
  0xf0   :  { %v96_v7 = vpop.xlane.xlu0 %95 }
  0xf1   :  { %v99_v8 = vmul.f32 0.03125, %v96_v7  ;;  %v102_v9 = vmul.f32 %v100_v6, %v100_v6 }
  0xf3   :  { %v101_v10 = vsub.f32 %v89_v1, %v99_v8  ;;  %v104_v11 = vsel %vm90_vm0, %v102_v9, 0.0 }
  0xf4   :  { %105 = vadd.xlane.f32.xlu1 %v104_v11 }
  0xf5   :  { %v103_v12 = vmul.f32 %v101_v10, %v101_v10 }
  0xf7   :  { %v107_v13 = vsel %vm90_vm0, %v103_v12, 0.0 }
  0xf8   :  { %108 = vadd.xlane.f32.xlu1 %v107_v13 }
 0x181   :  { %v106_v17 = vpop.xlane.xlu1 %105 }
 0x182   :  { %v110_v18 = vmul.f32 0.03125, %v106_v17 }
 0x184   :  { %v112_v19 = vadd.f32 1e-05, %v110_v18 }
 0x185   :  { %v109_v20 = vpop.xlane.xlu1 %108 }
 0x186   :  { %259 = vrsqrt.f32 %v112_v19  ;;  %v111_v21 = vmul.f32 0.03125, %v109_v20 }
 0x188   :  { %v113_v22 = vadd.f32 1e-05, %v111_v21 }
 0x18a   :  { %261 = vrsqrt.f32 %v113_v22 }
 0x190   :  { %v260_v23 = vpop.eup %259 }
 0x191   :  { %v116_v24 = vmul.f32 %v260_v23, %v100_v6 }
 0x193   :  { %v125_v27 = vmul.f32 %v228_v25, %v116_v24 }
 0x194   :  { %v262_v26 = vpop.eup %261 }
 0x195   :  { %v117_v28 = vmul.f32 %v262_v26, %v101_v10  ;;  %v134_v31 = vadd.f32 %v229_v29, %v125_v27 }
 0x197   :  { %v126_v30 = vmul.f32 %v228_v25, %v117_v28 }
 0x199   :  { %v135_v32 = vadd.f32 %v229_v29, %v126_v30 }
 0x19b   :  { %v136_v33 = vpack.c.bf16 %v135_v32, %v134_v31 }
 0x19d   :  { %137 = vst.msk [vmem:[#allocation2] sm:$0xff] %vm90_vm0, %v136_v33 }
 0x1a4   :  { %v138_v34 = vld [vmem:[#allocation2] sm:$0xff] }
 0x1a5   :  { %242 = vmatmul.mubr.msk.bf16.vlgmr.msra.gmra.mrb[0].mxu0 %vm90_vm0, %v138_v34 }
 0x278   :  { %v200_v36 = vpop.f32.mrb[0].mxu0 }
 0x279   :  { %v201_v37 = vadd.f32 %v230_v35, %v200_v36  ;;  %v243_v38 = vpop.f32.mrb[1].mxu0 }
 0x27a   :  { %v203_v39 = vpop.f32.mrb[2].mxu0 }
 0x27b   :  { %207 = vst.msk [vmem:[#allocation12] sm:$0xff] %vm90_vm0, %v201_v37  ;;  %v204_v40 = vadd.f32 %v230_v35, %v203_v39  ;;  %v244_v41 = vpop.f32.mrb[3].mxu0 }
 0x27d   :  { %208 = vst.msk [vmem:[#allocation12 + $0x8] sm:$0xff] %vm90_vm0, %v204_v40 }
 0x27e   :  { %384 = shalt.err (!%p381_p2)
}
 0x27f   :  { %s385_s10 = scalar_lea.hbm %s543_s5, 256 }
 0x280   :  { %p386_p3 = scmp.ne.s32.totalorder %s543_s5, %s385_s10  ;;  %p389_p4 = scmp.lt.u32.totalorder %s385_s10, %s543_s5 }
 0x282   :  { %p391_p5 = pnand %p389_p4, %p386_p3 }
 0x284   :  { %394 = shalt.err (!%p391_p5)
}
 0x285   :  { %220 = dma.vmem_to_hbm [thread:$0]  %s215_s6, 256, %s543_s5, [#allocation5], %s408_s3, %s408_s3, %s409_s21  }
 0x286   :  { %401 = dma.done.wait [#allocation5], 256  }
 0x287   :  { %402 = vsyncadd [#allocation5], 4294967040 }
 0x288   :  { %224 = vsyncpa [#allocation4], 1 }
 0x289   :  { %225 = vsyncpa [#allocation7], 1 }
 0x28a   :  { %226 = vsyncpa [#allocation10], 1 }
 0x28b   :  { %227 = vsyncpa [#allocation5], 1 }

</bundles_post_ra>
